<compile_context>
chip_gen: v6e
topology: v6e:2x2x1
jax: 0.10.0
libtpu: 0.0.40
codegen_flags: <defaults>
</compile_context>

<pallas_src>
import functools

import jax
import jax.numpy as jnp
from jax import lax
from jax.experimental import pallas as pl
from jax.experimental.pallas import tpu as pltpu


def _relu_inorm_kernel(x_ref, o_ref, *, eps):
    # x_ref / o_ref: (Rb, L). Each row is one (n, c) instance; normalize per row.
    a = jnp.maximum(x_ref[...].astype(jnp.float32), 0.0)        # ReLU first
    inv_l = jnp.float32(1.0 / a.shape[-1])
    mean = jnp.sum(a, axis=-1, keepdims=True) * inv_l
    xc = a - mean
    var = jnp.sum(xc * xc, axis=-1, keepdims=True) * inv_l      # biased variance
    inv_std = lax.rsqrt(var + eps)
    o_ref[...] = (xc * inv_std).astype(o_ref.dtype)


def relu_instance_norm1d(x_ncl, *, eps=1e-5):
    """x_ncl: (N, C, L) float32.  Returns InstanceNorm1d(ReLU(x)), affine=False."""
    N, C, L = x_ncl.shape
    R = N * C
    x2 = x_ncl.reshape(R, L)  # free reshape: (N, C, L) is row-major contiguous

    # Rows per block: a multiple of 8 (f32 sublanes) that divides R, capped so
    # one block buffer stays <= ~4 MiB (double-buffered in + out << 32 MiB
    # scoped VMEM on all of v5e / v6e / v7x).
    if R % 8 == 0:
        bytes_per_row = 4 * L
        max_rows = max(8, min(R, (4 * 1024 * 1024) // max(bytes_per_row, 1)))
        rb = 8
        while rb * 2 <= max_rows and R % (rb * 2) == 0:
            rb *= 2
    else:
        rb = R  # fallback: one block covering all rows (block == full dim is legal)

    kernel = functools.partial(_relu_inorm_kernel, eps=eps)
    out2 = pl.pallas_call(
        kernel,
        out_shape=jax.ShapeDtypeStruct((R, L), x_ncl.dtype),
        grid=(R // rb,),
        in_specs=[pl.BlockSpec((rb, L), lambda r: (r, 0))],
        out_specs=pl.BlockSpec((rb, L), lambda r: (r, 0)),
        compiler_params=pltpu.CompilerParams(
            dimension_semantics=("parallel",)),
    )(x2)
    return out2.reshape(N, C, L)


if __name__ == "__main__":
    # Small shapes consistent with InstanceNorm1d(features=4) on an (N, C, L) input.
    N, C, L = 2, 4, 256
    eps = 1e-5

    key = jax.random.PRNGKey(0)
    x = jax.random.normal(key, (N, C, L), dtype=jnp.float32)

    out = relu_instance_norm1d(x, eps=eps)
    jax.block_until_ready(out)

    # Pure-JAX reference of the same semantics: InstanceNorm1d(ReLU(x)),
    # affine=False, biased variance over L.
    a = jnp.maximum(x, 0.0)
    mean = jnp.mean(a, axis=-1, keepdims=True)
    var = jnp.mean((a - mean) ** 2, axis=-1, keepdims=True)
    ref = (a - mean) * lax.rsqrt(var + eps)

    assert jnp.allclose(out, ref, atol=1e-4, rtol=1e-4), float(
        jnp.max(jnp.abs(out - ref)))
    print("KERNEL_OK")
</pallas_src>

<mosaic_0001>
module attributes {stable_mosaic.version = 11 : i64} {
  func.func @_relu_inorm_kernel(%arg0: i32, %arg1: memref<8x256xf32, #tpu.memory_space<vmem>>, %arg2: memref<8x256xf32, #tpu.memory_space<vmem>>) attributes {dimension_semantics = [#tpu.dimension_semantics<parallel>], iteration_bounds = array<i64: 1>, scalar_prefetch = 0 : i64, scratch_operands = 0 : i64, tpu.core_type = #tpu.core_type<tc>, window_params = [{transform_indices = @transform_0, window_bounds = array<i64: 8, 256>}, {transform_indices = @transform_1, window_bounds = array<i64: 8, 256>}]} {
    %c0 = arith.constant 0 : index
    %c0_0 = arith.constant 0 : index
    %0 = vector.load %arg1[%c0, %c0_0] : memref<8x256xf32, #tpu.memory_space<vmem>>, vector<8x256xf32>
    %cst = arith.constant 0.000000e+00 : f32
    %1 = vector.broadcast %cst : f32 to vector<8x256xf32>
    %2 = arith.maximumf %0, %1 : vector<8x256xf32>
    %cst_1 = arith.constant dense<0.000000e+00> : vector<8xf32>
    %3 = vector.multi_reduction <add>, %2, %cst_1 [1] : vector<8x256xf32> to vector<8xf32>
    %4 = vector.shape_cast %3 : vector<8xf32> to vector<8x1xf32>
    %cst_2 = arith.constant 3.906250e-03 : f32
    %5 = vector.broadcast %cst_2 : f32 to vector<8x1xf32>
    %6 = arith.mulf %4, %5 : vector<8x1xf32>
    %7 = vector.broadcast %6 : vector<8x1xf32> to vector<8x256xf32>
    %8 = arith.subf %2, %7 : vector<8x256xf32>
    %9 = arith.mulf %8, %8 : vector<8x256xf32>
    %cst_3 = arith.constant dense<0.000000e+00> : vector<8xf32>
    %10 = vector.multi_reduction <add>, %9, %cst_3 [1] : vector<8x256xf32> to vector<8xf32>
    %11 = vector.shape_cast %10 : vector<8xf32> to vector<8x1xf32>
    %cst_4 = arith.constant 3.906250e-03 : f32
    %12 = vector.broadcast %cst_4 : f32 to vector<8x1xf32>
    %13 = arith.mulf %11, %12 : vector<8x1xf32>
    %cst_5 = arith.constant 9.99999974E-6 : f32
    %14 = vector.broadcast %cst_5 : f32 to vector<8x1xf32>
    %15 = arith.addf %13, %14 : vector<8x1xf32>
    %16 = math.rsqrt %15 : vector<8x1xf32>
    %17 = vector.broadcast %16 : vector<8x1xf32> to vector<8x256xf32>
    %18 = arith.mulf %8, %17 : vector<8x256xf32>
    %c0_6 = arith.constant 0 : index
    %c0_7 = arith.constant 0 : index
    %19 = vector.load %arg2[%c0_6, %c0_7] : memref<8x256xf32, #tpu.memory_space<vmem>>, vector<8x256xf32>
    tpu.vector_store %arg2[%c0_6, %c0_7], %18 {strides = array<i32>} : memref<8x256xf32, #tpu.memory_space<vmem>>, vector<8x256xf32>,
    return
  }
  func.func @transform_0(%arg0: i32) -> (i32, i32) {
    %c0_i32 = arith.constant 0 : i32
    %c0_i32_0 = arith.constant 0 : i32
    return %arg0, %c0_i32 : i32, i32
  }
  func.func @transform_1(%arg0: i32) -> (i32, i32) {
    %c0_i32 = arith.constant 0 : i32
    %c0_i32_0 = arith.constant 0 : i32
    return %arg0, %c0_i32 : i32, i32
  }
}

</mosaic_0001>

<bundles_post_ra>
// kernel: tpu_custom_call.1
= control target key start
LH: loop header
LB: loop body
LE: loop exit
PB: predicated region body
PF: predicated region fallthrough
CT: control target
= control target key end

     0   :  { %6 = vsyncpa [#allocation3], 0  ;;  %s124_s0 = inlined_call_operand.hbm [shape: f32[8,256], index: 0, kind: input, shape index: {}]   ;;  %s125_s1 = inlined_call_operand.hbm [shape: f32[8,256], index: 1, kind: output, shape index: {}]  }
   0x1   :  { %7 = vsyncpa [#allocation4], 0  ;;  %s106_s6 = smov [#allocation2]  }
   0x2   :  { %s14_s7 = sshll.u32 %s106_s6, 4  ;;  %s15_s7 = int_to_ptr.vmem [resolvable:$true] %s14_s7 }
   0x3   :  { %s70_s8 = scalar_lea.vmem %s15_s7, 256  ;;  %p75_p1 = scmp.lt.s32.totalorder %s15_s7, %s15_s7 }
   0x4   :  { %p71_p0 = scmp.ne.s32.totalorder %s15_s7, %s70_s8  ;;  %p76_p2 = scmp.lt.s32.totalorder %s70_s8, %s70_s8 }
   0x6   :  { %p77_p3 = por %p76_p2, %p75_p1 }
   0x8   :  { %p78_p4 = pnand %p77_p3, %p71_p0 }
   0xa   :  { %81 = shalt.err (!%p78_p4)
}
   0xb   :  { %17 = dma.hbm_to_vmem [thread:$0]  %s124_s0, 256, %s15_s7, [#allocation3]  }
   0xc   :  { %102 = dma.done.wait [#allocation3], 256  }
   0xd   :  { %103 = vsyncadd [#allocation3], 4294967040  ;;  %v21_v0 = vld [vmem:[#allocation2] sm:$0xff]  ;;  %v22_v1 = vld [vmem:[#allocation2 + $0x8] sm:$0xff]  ;;  %s107_s0 = smov [#allocation5]  }
   0xe   :  { %v23_v2 = vmax.f32 %v21_v0, 0.0  ;;  %v24_v3 = vmax.f32 %v22_v1, 0.0  ;;  %s49_s11 = sshll.u32 %s107_s0, 4  ;;  %s50_s11 = int_to_ptr.vmem [resolvable:$true] %s49_s11 }
   0xf   :  { %s82_s12 = scalar_lea.vmem %s50_s11, 256  ;;  %p87_p6 = scmp.lt.s32.totalorder %s50_s11, %s50_s11 }
  0x10   :  { %v25_v4 = vadd.f32 %v24_v3, %v23_v2  ;;  %p83_p5 = scmp.ne.s32.totalorder %s50_s11, %s82_s12  ;;  %p88_p7 = scmp.lt.s32.totalorder %s82_s12, %s82_s12 }
  0x12   :  { %26 = vadd.xlane.f32.xlu0 %v25_v4  ;;  %p89_p8 = por %p88_p7, %p87_p6 }
  0x14   :  { %p90_p9 = pnand %p89_p8, %p83_p5 }
  0x9b   :  { %v27_v5 = vpop.xlane.xlu0 %26 }
  0x9c   :  { %v28_v6 = vmul.f32 0.00390625, %v27_v5 }
  0x9e   :  { %v29_v7 = vsub.f32 %v23_v2, %v28_v6  ;;  %v30_v8 = vsub.f32 %v24_v3, %v28_v6 }
  0xa0   :  { %v31_v9 = vmul.f32 %v29_v7, %v29_v7  ;;  %v32_v10 = vmul.f32 %v30_v8, %v30_v8 }
  0xa2   :  { %v33_v11 = vadd.f32 %v32_v10, %v31_v9 }
  0xa4   :  { %34 = vadd.xlane.f32.xlu0 %v33_v11 }
 0x12d   :  { %v35_v12 = vpop.xlane.xlu0 %34 }
 0x12e   :  { %v36_v13 = vmul.f32 0.00390625, %v35_v12 }
 0x130   :  { %v37_v14 = vadd.f32 1e-05, %v36_v13 }
 0x132   :  { %60 = vrsqrt.f32 %v37_v14 }
 0x13f   :  { %v61_v15 = vpop.eup %60 }
 0x140   :  { %v39_v16 = vmul.f32 %v61_v15, %v29_v7  ;;  %v40_v17 = vmul.f32 %v61_v15, %v30_v8 }
 0x142   :  { %41 = vst [vmem:[#allocation5] sm:$0xff] %v39_v16  ;;  %42 = vst [vmem:[#allocation5 + $0x8] sm:$0xff] %v40_v17 }
 0x143   :  { %93 = shalt.err (!%p90_p9)
}
 0x144   :  { %52 = dma.vmem_to_hbm [thread:$0]  %s50_s11, 256, %s125_s1, [#allocation4]  }
 0x145   :  { %104 = dma.done.wait [#allocation4], 256  }
 0x146   :  { %105 = vsyncadd [#allocation4], 4294967040 }
 0x147   :  { %56 = vsyncpa [#allocation3], 1 }
 0x148   :  { %57 = vsyncpa [#allocation4], 1 }

</bundles_post_ra>
